<compile_context>
chip_gen: v7x
topology: tpu7x:2x2x1
jax: 0.10.0
libtpu: 0.0.40
codegen_flags: <defaults>
</compile_context>

<pallas_src>
import functools

import jax
import jax.numpy as jnp
from jax.experimental import pallas as pl
from jax.experimental.pallas import tpu as pltpu


# ----------------------------------------------------------------------------
# Sizing helpers
# ----------------------------------------------------------------------------
def _pad_up(n, m):
    return ((n + m - 1) // m) * m


def _vmem_capacity_bytes():
    """Per-core VMEM capacity; conservative (v7x 64 MiB) fallback if the query fails."""
    try:
        return int(pltpu.get_tpu_info().vmem_capacity_bytes)
    except Exception:
        return 64 << 20


def _choose_thw(c, hw, itemsize, budget_bytes, max_lane_blocks=32):
    """Spatial chunk width: multiple of 128, <= HW, ~budget bytes per image."""
    if hw <= 128:
        return hw                                   # full spatial dim, one block
    c_pad = _pad_up(c, 8)
    budget_elems = max(budget_bytes // max(c_pad * itemsize, 1), 128)
    thw_max = max(128, min((budget_elems // 128) * 128,
                           (hw // 128) * 128,
                           max_lane_blocks * 128))  # cap per-chunk lane-fold unroll
    nk = pl.cdiv(hw, thw_max)
    thw = pl.cdiv(pl.cdiv(hw, nk), 128) * 128       # balance chunk sizes
    return max(128, min(thw, thw_max))


def _choose_tb(b, per_image_bytes, budget_bytes):
    """Images per grid step: divisor of B; keeps >= 2 parallel steps when B >= 2."""
    max_tb = b if b < 2 else b // 2                 # keep >=2 parallel grid points
    tb = 1
    for cand in range(2, max_tb + 1):
        if b % cand == 0 and cand * per_image_bytes <= budget_bytes:
            tb = cand
    return tb


# ----------------------------------------------------------------------------
# Kernel: grid = (B // TB, nk). Spatial chunks fold into lane-wide VMEM
# accumulators; the epilogue (cross-lane reduce + shared MLP + sigmoid) runs
# once per batch block, on the last spatial chunk.
# ----------------------------------------------------------------------------
def _channel_attn_kernel(x_ref, w1_ref, b1_ref, w2_ref, b2_ref, o_ref,
                         sum_ref, max_ref, *, hw, thw, lw):
    k = pl.program_id(1)
    nk = pl.num_programs(1)

    xv = x_ref[...].astype(jnp.float32)              # (TB, C, thw), lane-dense

    if hw % thw != 0:
        # Ragged tail: lanes past HW hold OOB garbage -> neutralize them.
        lane = jax.lax.broadcasted_iota(jnp.int32, xv.shape, 2)
        valid = (k * thw + lane) < hw
        xs = jnp.where(valid, xv, 0.0)
        xm = jnp.where(valid, xv, -jnp.inf)
    else:
        xs, xm = xv, xv

    # Fold the chunk down to `lw` lanes with pure VPU adds/maxes; the single
    # cross-lane (XLU) reduce is deferred to the epilogue.
    part_s = xs[:, :, 0:lw]
    part_m = xm[:, :, 0:lw]
    for i in range(1, thw // lw):
        sl = slice(i * lw, (i + 1) * lw)
        part_s = part_s + xs[:, :, sl]
        part_m = jnp.maximum(part_m, xm[:, :, sl])

    @pl.when(k == 0)
    def _():
        sum_ref[...] = part_s
        max_ref[...] = part_m

    @pl.when(k > 0)
    def _():
        sum_ref[...] = sum_ref[...] + part_s
        max_ref[...] = jnp.maximum(max_ref[...], part_m)

    @pl.when(k == nk - 1)
    def _():
        avg = jnp.sum(sum_ref[...], axis=2) * (1.0 / hw)      # (TB, C)
        mx = jnp.max(max_ref[...], axis=2)                    # (TB, C)
        pooled = jnp.concatenate([avg, mx], axis=0)           # (2*TB, C), batched MLP
        w1 = w1_ref[...].astype(jnp.float32)                  # (C, mid)
        w2 = w2_ref[...].astype(jnp.float32)                  # (mid, C)
        h = jnp.dot(pooled, w1, preferred_element_type=jnp.float32)
        h = jnp.maximum(h + b1_ref[...].astype(jnp.float32), 0.0)    # ReLU, (2TB, mid)
        y = jnp.dot(h, w2, preferred_element_type=jnp.float32)
        y = y + b2_ref[...].astype(jnp.float32)               # (2TB, C)
        tb = avg.shape[0]
        att = jax.nn.sigmoid(y[:tb, :] + y[tb:, :])           # (TB, C)
        o_ref[...] = att[:, None, :].astype(o_ref.dtype)      # (TB, 1, C)


# ----------------------------------------------------------------------------
# Wrapper
# ----------------------------------------------------------------------------
def channel_attention_pallas(x, W1, b1, W2, b2):
    B, C, H, W = x.shape
    mid = W1.shape[0]
    HW = H * W
    itemsize = x.dtype.itemsize

    x_flat = x.reshape(B, C, HW)                     # lane-dense spatial axis
    w1_t = W1.T                                      # (C, mid): pooled @ W1^T
    w2_t = W2.T                                      # (mid, C): h @ W2^T
    b1_row = b1.reshape(1, mid)
    b2_row = b2.reshape(1, C)

    capacity = _vmem_capacity_bytes()
    step_budget = min(4 << 20, capacity // 8)        # ~1-4 MiB of x per grid step

    thw = _choose_thw(C, HW, itemsize, step_budget)
    lw = thw if thw < 128 else 128
    nk = pl.cdiv(HW, thw)

    c_pad = _pad_up(C, 8)
    per_image_bytes = c_pad * _pad_up(thw, 128) * itemsize    # padded VMEM footprint
    TB = _choose_tb(B, per_image_bytes, step_budget)

    # Double-buffered x block + two f32 accumulators + weights/output slack.
    need = (2 * TB * per_image_bytes
            + 2 * TB * c_pad * _pad_up(lw, 128) * 4
            + (4 << 20))
    vmem_limit = int(min(max(32 << 20, need), capacity * 7 // 8))

    kernel = functools.partial(_channel_attn_kernel, hw=HW, thw=thw, lw=lw)

    out = pl.pallas_call(
        kernel,
        out_shape=jax.ShapeDtypeStruct((B, 1, C), jnp.float32),
        grid=(B // TB, nk),
        in_specs=[
            pl.BlockSpec((TB, C, thw), lambda b, k: (b, 0, k)),   # x chunk
            pl.BlockSpec((C, mid), lambda b, k: (0, 0)),          # W1^T (resident)
            pl.BlockSpec((1, mid), lambda b, k: (0, 0)),          # b1
            pl.BlockSpec((mid, C), lambda b, k: (0, 0)),          # W2^T (resident)
            pl.BlockSpec((1, C), lambda b, k: (0, 0)),            # b2
        ],
        out_specs=pl.BlockSpec((TB, 1, C), lambda b, k: (b, 0, 0)),
        scratch_shapes=[
            pltpu.VMEM((TB, C, lw), jnp.float32),    # running lane-wise sums
            pltpu.VMEM((TB, C, lw), jnp.float32),    # running lane-wise maxes
        ],
        compiler_params=pltpu.CompilerParams(
            dimension_semantics=("parallel", "arbitrary"),
            vmem_limit_bytes=vmem_limit,
        ),
    )(x_flat, w1_t, b1_row, w2_t, b2_row)

    return out.reshape(B, C, 1, 1)


# ----------------------------------------------------------------------------
# Pure-JAX reference for validation
# ----------------------------------------------------------------------------
def channel_attention_reference(x, W1, b1, W2, b2):
    avg = jnp.mean(x, axis=(2, 3))                   # (B, C)
    mx = jnp.max(x, axis=(2, 3))                     # (B, C)

    def mlp(v):
        return jax.nn.relu(v @ W1.T + b1) @ W2.T + b2

    return jax.nn.sigmoid(mlp(avg) + mlp(mx))[:, :, None, None]


if __name__ == "__main__":
    B, C, H, W = 2, 32, 16, 16
    reduction = 16
    mid = C // reduction                             # = 2

    key = jax.random.PRNGKey(0)
    k1, k2, k3, k4, k5 = jax.random.split(key, 5)
    W1 = jax.random.normal(k1, (mid, C), jnp.float32) * 0.1   # Linear(C -> mid)
    b1 = jax.random.normal(k2, (mid,), jnp.float32) * 0.1
    W2 = jax.random.normal(k3, (C, mid), jnp.float32) * 0.1   # Linear(mid -> C)
    b2 = jax.random.normal(k4, (C,), jnp.float32) * 0.1
    x = jax.random.normal(k5, (B, C, H, W), jnp.float32)

    out = channel_attention_pallas(x, W1, b1, W2, b2)
    out = jax.block_until_ready(out)

    ref = channel_attention_reference(x, W1, b1, W2, b2)
    assert out.shape == (B, C, 1, 1)
    assert jnp.allclose(out, ref, atol=1e-4, rtol=1e-4), (
        float(jnp.max(jnp.abs(out - ref))))

    print("KERNEL_OK")
</pallas_src>

<mosaic_0001>
module attributes {stable_mosaic.version = 11 : i64} {
  func.func @_channel_attn_kernel(%arg0: i32, %arg1: i32, %arg2: memref<1x32x256xf32, #tpu.memory_space<vmem>>, %arg3: memref<32x2xf32, #tpu.memory_space<vmem>>, %arg4: memref<1x2xf32, #tpu.memory_space<vmem>>, %arg5: memref<2x32xf32, #tpu.memory_space<vmem>>, %arg6: memref<1x32xf32, #tpu.memory_space<vmem>>, %arg7: memref<1x1x32xf32, #tpu.memory_space<vmem>>, %arg8: memref<1x32x128xf32, #tpu.memory_space<vmem>>, %arg9: memref<1x32x128xf32, #tpu.memory_space<vmem>>) attributes {dimension_semantics = [#tpu.dimension_semantics<parallel>, #tpu.dimension_semantics<arbitrary>], iteration_bounds = array<i64: 2, 1>, scalar_prefetch = 0 : i64, scratch_operands = 2 : i64, tpu.core_type = #tpu.core_type<tc>, window_params = [{transform_indices = @transform_0, window_bounds = array<i64: 1, 32, 256>}, {pipeline_mode = #tpu.pipeline_mode<synchronous>, transform_indices = @transform_1, window_bounds = array<i64: 32, 2>}, {pipeline_mode = #tpu.pipeline_mode<synchronous>, transform_indices = @transform_2, window_bounds = array<i64: 1, 2>}, {pipeline_mode = #tpu.pipeline_mode<synchronous>, transform_indices = @transform_3, window_bounds = array<i64: 2, 32>}, {pipeline_mode = #tpu.pipeline_mode<synchronous>, transform_indices = @transform_4, window_bounds = array<i64: 1, 32>}, {transform_indices = @transform_5, window_bounds = array<i64: 1, 1, 32>}]} {
    %c0 = arith.constant 0 : index
    %c0_0 = arith.constant 0 : index
    %c0_1 = arith.constant 0 : index
    %0 = vector.load %arg2[%c0, %c0_0, %c0_1] : memref<1x32x256xf32, #tpu.memory_space<vmem>>, vector<1x32x256xf32>
    %1 = vector.extract_strided_slice %0 {offsets = [0, 0, 0], sizes = [1, 32, 128], strides = [1, 1, 1]} : vector<1x32x256xf32> to vector<1x32x128xf32>
    %2 = vector.extract_strided_slice %0 {offsets = [0, 0, 0], sizes = [1, 32, 128], strides = [1, 1, 1]} : vector<1x32x256xf32> to vector<1x32x128xf32>
    %3 = vector.extract_strided_slice %0 {offsets = [0, 0, 128], sizes = [1, 32, 128], strides = [1, 1, 1]} : vector<1x32x256xf32> to vector<1x32x128xf32>
    %4 = arith.addf %1, %3 : vector<1x32x128xf32>
    %5 = vector.extract_strided_slice %0 {offsets = [0, 0, 128], sizes = [1, 32, 128], strides = [1, 1, 1]} : vector<1x32x256xf32> to vector<1x32x128xf32>
    %6 = arith.maximumf %2, %5 : vector<1x32x128xf32>
    %c0_i32 = arith.constant 0 : i32
    %7 = arith.cmpi eq, %arg1, %c0_i32 : i32
    %8 = arith.extui %7 : i1 to i32
    %c0_i32_2 = arith.constant 0 : i32
    %9 = arith.cmpi ne, %8, %c0_i32_2 : i32
    scf.if %9 {
      %c0_7 = arith.constant 0 : index
      %c0_8 = arith.constant 0 : index
      %c0_9 = arith.constant 0 : index
      %16 = vector.load %arg8[%c0_7, %c0_8, %c0_9] : memref<1x32x128xf32, #tpu.memory_space<vmem>>, vector<1x32x128xf32>
      tpu.vector_store %arg8[%c0_7, %c0_8, %c0_9], %4 {strides = array<i32>} : memref<1x32x128xf32, #tpu.memory_space<vmem>>, vector<1x32x128xf32>,
      %c0_10 = arith.constant 0 : index
      %c0_11 = arith.constant 0 : index
      %c0_12 = arith.constant 0 : index
      %17 = vector.load %arg9[%c0_10, %c0_11, %c0_12] : memref<1x32x128xf32, #tpu.memory_space<vmem>>, vector<1x32x128xf32>
      tpu.vector_store %arg9[%c0_10, %c0_11, %c0_12], %6 {strides = array<i32>} : memref<1x32x128xf32, #tpu.memory_space<vmem>>, vector<1x32x128xf32>,
    } else {
    }
    %c0_i32_3 = arith.constant 0 : i32
    %10 = arith.cmpi sgt, %arg1, %c0_i32_3 : i32
    %11 = arith.extui %10 : i1 to i32
    %c0_i32_4 = arith.constant 0 : i32
    %12 = arith.cmpi ne, %11, %c0_i32_4 : i32
    scf.if %12 {
      %c0_7 = arith.constant 0 : index
      %c0_8 = arith.constant 0 : index
      %c0_9 = arith.constant 0 : index
      %16 = vector.load %arg8[%c0_7, %c0_8, %c0_9] : memref<1x32x128xf32, #tpu.memory_space<vmem>>, vector<1x32x128xf32>
      %17 = arith.addf %16, %4 : vector<1x32x128xf32>
      %c0_10 = arith.constant 0 : index
      %c0_11 = arith.constant 0 : index
      %c0_12 = arith.constant 0 : index
      %18 = vector.load %arg8[%c0_10, %c0_11, %c0_12] : memref<1x32x128xf32, #tpu.memory_space<vmem>>, vector<1x32x128xf32>
      tpu.vector_store %arg8[%c0_10, %c0_11, %c0_12], %17 {strides = array<i32>} : memref<1x32x128xf32, #tpu.memory_space<vmem>>, vector<1x32x128xf32>,
      %c0_13 = arith.constant 0 : index
      %c0_14 = arith.constant 0 : index
      %c0_15 = arith.constant 0 : index
      %19 = vector.load %arg9[%c0_13, %c0_14, %c0_15] : memref<1x32x128xf32, #tpu.memory_space<vmem>>, vector<1x32x128xf32>
      %20 = arith.maximumf %19, %6 : vector<1x32x128xf32>
      %c0_16 = arith.constant 0 : index
      %c0_17 = arith.constant 0 : index
      %c0_18 = arith.constant 0 : index
      %21 = vector.load %arg9[%c0_16, %c0_17, %c0_18] : memref<1x32x128xf32, #tpu.memory_space<vmem>>, vector<1x32x128xf32>
      tpu.vector_store %arg9[%c0_16, %c0_17, %c0_18], %20 {strides = array<i32>} : memref<1x32x128xf32, #tpu.memory_space<vmem>>, vector<1x32x128xf32>,
    } else {
    }
    %c0_i32_5 = arith.constant 0 : i32
    %13 = arith.cmpi eq, %arg1, %c0_i32_5 : i32
    %14 = arith.extui %13 : i1 to i32
    %c0_i32_6 = arith.constant 0 : i32
    %15 = arith.cmpi ne, %14, %c0_i32_6 : i32
    scf.if %15 {
      %c0_7 = arith.constant 0 : index
      %c0_8 = arith.constant 0 : index
      %c0_9 = arith.constant 0 : index
      %16 = vector.load %arg8[%c0_7, %c0_8, %c0_9] : memref<1x32x128xf32, #tpu.memory_space<vmem>>, vector<1x32x128xf32>
      %cst = arith.constant dense<0.000000e+00> : vector<1x32xf32>
      %17 = vector.multi_reduction <add>, %16, %cst [2] : vector<1x32x128xf32> to vector<1x32xf32>
      %cst_10 = arith.constant 3.906250e-03 : f32
      %18 = vector.broadcast %cst_10 : f32 to vector<1x32xf32>
      %19 = arith.mulf %17, %18 : vector<1x32xf32>
      %c0_11 = arith.constant 0 : index
      %c0_12 = arith.constant 0 : index
      %c0_13 = arith.constant 0 : index
      %20 = vector.load %arg9[%c0_11, %c0_12, %c0_13] : memref<1x32x128xf32, #tpu.memory_space<vmem>>, vector<1x32x128xf32>
      %cst_14 = arith.constant dense<0xFF800000> : vector<1x32xf32>
      %21 = vector.multi_reduction <maximumf>, %20, %cst_14 [2] : vector<1x32x128xf32> to vector<1x32xf32>
      %22 = tpu.concatenate %19, %21 in 0 : vector<1x32xf32>, vector<1x32xf32> -> vector<2x32xf32>
      %c0_15 = arith.constant 0 : index
      %c0_16 = arith.constant 0 : index
      %23 = vector.load %arg3[%c0_15, %c0_16] : memref<32x2xf32, #tpu.memory_space<vmem>>, vector<32x2xf32>
      %c0_17 = arith.constant 0 : index
      %c0_18 = arith.constant 0 : index
      %24 = vector.load %arg5[%c0_17, %c0_18] : memref<2x32xf32, #tpu.memory_space<vmem>>, vector<2x32xf32>
      %cst_19 = arith.constant dense<0.000000e+00> : vector<2x2xf32>
      %25 = tpu.matmul %22, %23, %cst_19 {dimension_numbers = #tpu.dot_dimension_numbers<[1], [0], [0], [1], [0, 0, 1, 1], [], []>} : vector<2x32xf32>, vector<32x2xf32>, vector<2x2xf32> -> vector<2x2xf32>
      %c0_20 = arith.constant 0 : index
      %c0_21 = arith.constant 0 : index
      %26 = vector.load %arg4[%c0_20, %c0_21] : memref<1x2xf32, #tpu.memory_space<vmem>>, vector<1x2xf32>
      %27 = vector.broadcast %26 : vector<1x2xf32> to vector<2x2xf32>
      %28 = arith.addf %25, %27 : vector<2x2xf32>
      %cst_22 = arith.constant 0.000000e+00 : f32
      %29 = vector.broadcast %cst_22 : f32 to vector<2x2xf32>
      %30 = arith.maximumf %28, %29 : vector<2x2xf32>
      %cst_23 = arith.constant dense<0.000000e+00> : vector<2x32xf32>
      %31 = tpu.matmul %30, %24, %cst_23 {dimension_numbers = #tpu.dot_dimension_numbers<[1], [0], [0], [1], [0, 0, 1, 1], [], []>} : vector<2x2xf32>, vector<2x32xf32>, vector<2x32xf32> -> vector<2x32xf32>
      %c0_24 = arith.constant 0 : index
      %c0_25 = arith.constant 0 : index
      %32 = vector.load %arg6[%c0_24, %c0_25] : memref<1x32xf32, #tpu.memory_space<vmem>>, vector<1x32xf32>
      %33 = vector.broadcast %32 : vector<1x32xf32> to vector<2x32xf32>
      %34 = arith.addf %31, %33 : vector<2x32xf32>
      %35 = vector.extract_strided_slice %34 {offsets = [0, 0], sizes = [1, 32], strides = [1, 1]} : vector<2x32xf32> to vector<1x32xf32>
      %36 = vector.extract_strided_slice %34 {offsets = [1, 0], sizes = [1, 32], strides = [1, 1]} : vector<2x32xf32> to vector<1x32xf32>
      %37 = arith.addf %35, %36 : vector<1x32xf32>
      %38 = arith.negf %37 : vector<1x32xf32>
      %39 = math.exp %38 : vector<1x32xf32>
      %cst_26 = arith.constant 1.000000e+00 : f32
      %40 = vector.broadcast %cst_26 : f32 to vector<1x32xf32>
      %41 = arith.addf %40, %39 : vector<1x32xf32>
      %42 = arith.divf %40, %41 : vector<1x32xf32>
      %43 = vector.shape_cast %42 : vector<1x32xf32> to vector<1x1x32xf32>
      %c0_27 = arith.constant 0 : index
      %c0_28 = arith.constant 0 : index
      %c0_29 = arith.constant 0 : index
      %44 = vector.load %arg7[%c0_27, %c0_28, %c0_29] : memref<1x1x32xf32, #tpu.memory_space<vmem>>, vector<1x1x32xf32>
      tpu.vector_store %arg7[%c0_27, %c0_28, %c0_29], %43 {strides = array<i32>} : memref<1x1x32xf32, #tpu.memory_space<vmem>>, vector<1x1x32xf32>,
    } else {
    }
    return
  }
  func.func @transform_0(%arg0: i32, %arg1: i32) -> (i32, i32, i32) {
    %c0_i32 = arith.constant 0 : i32
    %c0_i32_0 = arith.constant 0 : i32
    return %arg0, %c0_i32, %arg1 : i32, i32, i32
  }
  func.func @transform_1(%arg0: i32, %arg1: i32) -> (i32, i32) {
    %c0_i32 = arith.constant 0 : i32
    %c0_i32_0 = arith.constant 0 : i32
    %c0_i32_1 = arith.constant 0 : i32
    return %c0_i32, %c0_i32_0 : i32, i32
  }
  func.func @transform_2(%arg0: i32, %arg1: i32) -> (i32, i32) {
    %c0_i32 = arith.constant 0 : i32
    %c0_i32_0 = arith.constant 0 : i32
    %c0_i32_1 = arith.constant 0 : i32
    return %c0_i32, %c0_i32_0 : i32, i32
  }
  func.func @transform_3(%arg0: i32, %arg1: i32) -> (i32, i32) {
    %c0_i32 = arith.constant 0 : i32
    %c0_i32_0 = arith.constant 0 : i32
    %c0_i32_1 = arith.constant 0 : i32
    return %c0_i32, %c0_i32_0 : i32, i32
  }
  func.func @transform_4(%arg0: i32, %arg1: i32) -> (i32, i32) {
    %c0_i32 = arith.constant 0 : i32
    %c0_i32_0 = arith.constant 0 : i32
    %c0_i32_1 = arith.constant 0 : i32
    return %c0_i32, %c0_i32_0 : i32, i32
  }
  func.func @transform_5(%arg0: i32, %arg1: i32) -> (i32, i32, i32) {
    %c0_i32 = arith.constant 0 : i32
    %c0_i32_0 = arith.constant 0 : i32
    %c0_i32_1 = arith.constant 0 : i32
    return %arg0, %c0_i32, %c0_i32_0 : i32, i32, i32
  }
}

</mosaic_0001>

<bundles_post_ra>
// kernel: tpu_custom_call.1
= control target key start
LH: loop header
LB: loop body
LE: loop exit
PB: predicated region body
PF: predicated region fallthrough
CT: control target
= control target key end

     0   :  { %10 = vsyncpa [#allocation5], 0  ;;  %s1145_s0 = inlined_call_operand.hbm [shape: f32[2,32,256], index: 0, kind: input, shape index: {}]   ;;  %s1146_s1 = inlined_call_operand.vmem [shape: f32[32,2], index: 1, kind: input, shape index: {}]   ;;  %s1147_s2 = inlined_call_operand.vmem [shape: f32[1,2], index: 2, kind: input, shape index: {}]   ;;  %s1148_s3 = inlined_call_operand.vmem [shape: f32[2,32], index: 3, kind: input, shape index: {}]   ;;  %s1149_s4 = inlined_call_operand.vmem [shape: f32[1,32], index: 4, kind: input, shape index: {}]   ;;  %s1150_s5 = inlined_call_operand.hbm [shape: f32[2,1,32], index: 5, kind: output, shape index: {}]  }
   0x1   :  { %12 = vsyncpa [#allocation5 + $0x1], 0 }
   0x2   :  { %13 = vsyncpa [#allocation6], 0 }
   0x3   :  { %15 = vsyncpa [#allocation6 + $0x1], 0  ;;  %s948_s18 = smov 0   ;;  %s950_s19 = smov 0  }
   0x4   :  { %s952_s20 = smov 0   ;;  %s954_s21 = smov 0  }
   0x5   :  { %s956_s22 = smov 0   ;;  %s958_s23 = smov 0  }
   0x6 LB: > { %s678_s24 = sadd.s32 4294967295, %s909_s23   ;;  %s679_s25 = sadd.s32 4294967294, %s909_s23   ;;  %s909_s23 = sphi %s958_s23, %s21_s23   ;;  %s905_s22 = sphi %s956_s22, %s1165_s22   ;;  %s901_s21 = sphi %s954_s21, %s1164_s21   ;;  %s897_s20 = sphi %s952_s20, %s1163_s20   ;;  %s893_s19 = sphi %s950_s19, %s1162_s19   ;;  %s889_s18 = sphi %s948_s18, %s1161_s18  }
   0x7   : > { %s33_s26 = sadd.s32 1, %s905_s22  ;;  %s42_s27 = sadd.s32 1, %s897_s20 }
   0x8   : > { %p35_p0 = scmp.ge.s32.totalorder %s33_s26, 2  ;;  %p49_p1 = scmp.ne.s32.totalorder %s897_s20, %s893_s19 }
   0x9   : > { %p50_p2 = scmp.eq.s32.totalorder %s909_s23, 0  ;;  %p55_p3 = scmp.ne.s32.totalorder %s893_s19, %s889_s18 }
   0xa   : > { %s1167_s26 = smov (%p35_p0, %s33_s26), 0  ;;  %p56_p5 = scmp.eq.s32.totalorder %s678_s24, 0 }
   0xb   : > { %p989_p4 = por %p50_p2, %p49_p1  ;;  %s37_s29 = ssub.s32 %s905_s22, %s1167_s26 }
   0xc   : > { %p163_p6 = scmp.eq.s32.totalorder %s678_s24, 1  ;;  %p40_p7 = scmp.eq.s32.totalorder %s37_s29, 0 }
   0xd   : > { %p995_p8 = por %p56_p5, %p55_p3  ;;  %p169_p10 = scmp.eq.s32.totalorder %s679_s25, 1 }
   0xe   : > { %p999_p9 = por %p163_p6, %p49_p1  ;;  %p738_p13 = scmp.lt.s32.totalorder %s909_s23, 2 }
   0xf   : > { %s1004_s7 = scalar_select %p40_p7, %s897_s20, %s42_s27  }
  0x10   : > { %s1154_s6 = scalar_select %p999_p9, 1, 0 }
  0x11   : > { %p1006_p11 = por %p169_p10, %p55_p3  ;;  %s201_s9 = sand.u32 1, %s897_s20  }
  0x12   : > { %s682_s10 = sshll.u32 %s201_s9, 6  ;;  %s696_s11 = sshll.u32 %s905_s22, 10 }
  0x13   : > { %s1155_s8 = scalar_select %p1006_p11, 1, 0 }
  0x14   : > { %s1017_s14 = scalar_lea.hbm %s1145_s0, %s696_s11  ;;  %s205_s15 = scalar_lea.vmem [#allocation4], %s682_s10 }
  0x15   : > { %s214_s16 = sshll.u32 %s205_s15, 4  ;;  %p1023_p0 = pnand %p738_p13, %p989_p4  ;;  %s1019_s16 = int_to_ptr.vmem [resolvable:$true] %s214_s16 }
  0x16   : > { %s1028_s24 = scalar_lea.sflag [#allocation5], %s201_s9  ;;  %s797_s25 = scalar_lea.hbm %s1017_s14, 1024 }
  0x17   : > { %p798_p2 = scmp.ne.s32.totalorder %s1017_s14, %s797_s25  ;;  %p799_p3 = pneg %p1023_p0 }
  0x18   : > { %s802_s28 = scalar_lea.hbm %s1145_s0, 2048  ;;  %p803_p4 = scmp.lt.u32.totalorder %s1017_s14, %s1145_s0 }
  0x19   : > { %p800_p5 = pnand %p799_p3, %p798_p2  ;;  %p804_p7 = scmp.lt.u32.totalorder %s802_s28, %s797_s25 }
  0x1a   : > { %p806_p13 = scmp.lt.u32.totalorder %s797_s25, %s1017_s14 }
  0x1b   : > { %p801_p6 = pneg %p800_p5  ;;  %p805_p10 = por %p804_p7, %p803_p4 }
  0x1d   : > { %p807_p12 = por %p806_p13, %p805_p10 }
  0x1f   : > { %p808_p1 = pnand %p807_p12, %p801_p6 }
  0x21   : > { %811 = shalt.err (!%p808_p1)
}
  0x22   : > { %s812_s9 = scalar_lea.vmem %s1019_s16, 1024  ;;  %s911_s12 = smov [#allocation4]  }
  0x23   : > { %p813_p2 = scmp.ne.s32.totalorder %s1019_s16, %s812_s9  ;;  %s817_s13 = sshll.u32 %s911_s12, 4  ;;  %s818_s13 = int_to_ptr.vmem [resolvable:$false] %s817_s13 }
  0x24   : > { %s819_s15 = scalar_lea.vmem %s818_s13, 2048  ;;  %p820_p9 = scmp.lt.s32.totalorder %s1019_s16, %s818_s13 }
  0x25   : > { %p815_p5 = pnand %p813_p2, %p799_p3  ;;  %p821_p4 = scmp.lt.s32.totalorder %s819_s15, %s812_s9 }
  0x27   : > { %p816_p11 = pneg %p815_p5  ;;  %p822_p7 = por %p821_p4, %p820_p9 }
  0x29   : > { %p823_p10 = pnand %p822_p7, %p816_p11 }
  0x2b   : > { %826 = shalt.err (!%p823_p10)
}
  0x2c   : > { %s912_s25 = smov 256   ;;  %s913_s27 = smov 16  }
  0x2d   : > { %733 = dma.hbm_to_vmem [thread:$0]  (!%p1023_p0), %s1017_s14, 1024, %s1019_s16, %s1028_s24, %s912_s25, %s912_s25, %s913_s27  }
  0x2e   : > { %p222_p12 = scmp.lt.s32.totalorder %s909_s23, 3  ;;  %p1157_p1 = scmp.ge.s32.totalorder %s909_s23, 1 }
  0x30   : > { %p223_p3 = pnand %p1157_p1, %p222_p12 }
  0x31   : > { %s1060_s29 = sand.u32 (!%p223_p3), 1, %s893_s19  }
  0x32   : > { %226 = sbr.rel (%p223_p3) target bundleno = 695 (0x2b7), region = 40  ;;  %s686_s28 = sshll.u32 (!%p223_p3), %s1060_s29, 6 }
  0x33   : > { %s229_s10 = scalar_lea.sflag (!%p223_p3), [#allocation5], %s1060_s29  ;;  %s232_s11 = scalar_lea.vmem (!%p223_p3), [#allocation4], %s686_s28 }
  0x39   : > { %880 = dma.done.wait (%p995_p8), %s229_s10, 1024  }
  0x3a   : > { %882 = vsyncadd (%p995_p8), %s229_s10, 4294966272  ;;  %v263_v0 = vld [vmem:[%s232_s11 + $0x20] sm:$0xff]  ;;  %v264_v1 = vld [vmem:[%s232_s11 + $0x28] sm:$0xff]  ;;  %v914_v19 = vmov 0.0|0.0   ;;  %vm915_vm0 = vmmov 0   ;;  %v916_v23 = vmov 0.0   ;;  %v350_v24 = vlaneseq }
  0x3b   : > { %v259_v2 = vld [vmem:[%s232_s11] sm:$0xff]  ;;  %v269_v3 = vadd.f32 %v264_v1, %v263_v0  ;;  %v260_v4 = vld [vmem:[%s232_s11 + $0x8] sm:$0xff]  ;;  %v265_v5 = vld [vmem:[%s232_s11 + $0x30] sm:$0xff]  ;;  %v273_v15 = vmax.f32 %v263_v0, %v264_v1  ;;  %720 = vmatprep.subr.bf16.mxu0 %v914_v19  ;;  %712 = vmatprep.mubr.msk.f32.mxu0 %vm915_vm0, %v916_v23  ;;  %vm361_vm1 = vcmask 130112   ;;  %vm368_vm2 = vcmask 195712   ;;  %s693_s30 = sshll.u32 %s901_s21, 4 }
  0x3c   : > { %v266_v6 = vld [vmem:[%s232_s11 + $0x38] sm:$0xff]  ;;  %v267_v7 = vadd.f32 %v260_v4, %v259_v2  ;;  %v261_v8 = vld [vmem:[%s232_s11 + $0x10] sm:$0xff]  ;;  %v271_v13 = vmax.f32 %v259_v2, %v260_v4  ;;  %v404_v16 = vld [vmem:[%s1146_s1] sm:$0xff]  ;;  %715 = vmatprep.subr.mxu1 %v916_v23  ;;  %717 = vmatprep.mubr.msk.f32.mxu1 %vm915_vm0, %v916_v23  ;;  %v351_v25 = vand.u32 127, %v350_v24  ;;  %v353_v28 = vshrl.u32 %v350_v24, 7  ;;  %s257_s14 = scalar_lea.vmem [#allocation7], %s1060_s29  ;;  %s1096_s9 = scalar_lea.hbm %s1150_s5, %s693_s30 }
  0x3d   : > { %v262_v9 = vld [vmem:[%s232_s11 + $0x18] sm:$0xff]  ;;  %326 = vadd.xlane.f32.xlu1 %v269_v3  ;;  %v270_v10 = vadd.f32 %v266_v6, %v265_v5  ;;  %v274_v14 = vmax.f32 %v265_v5, %v266_v6  ;;  %v405_v17 = vld [vmem:[%s1146_s1 + $0x8] sm:$0xff]  ;;  %v406_v20 = vld [vmem:[%s1146_s1 + $0x10] sm:$0xff]  ;;  %vm375_vm3 = vcmask 261312   ;;  %vm402_vm4 = vcmask 1040384   ;;  %s601_s16 = sshll.u32 %s257_s14, 4  ;;  %s1098_s16 = int_to_ptr.vmem [resolvable:$true] %s601_s16 }
  0x3e   : > { %322 = vadd.xlane.f32.xlu0 %v267_v7  ;;  %v268_v11 = vadd.f32 %v262_v9, %v261_v8  ;;  %v272_v12 = vmax.f32 %v261_v8, %v262_v9  ;;  %v721_v18 = vpack.c.bf16 %v405_v17, %v404_v16  ;;  %v407_v21 = vld [vmem:[%s1146_s1 + $0x18] sm:$0xff]  ;;  %v356_v27 = vadd.s32 4294967288, %v351_v25  ;;  %v408_v61 = vld [vmem:[%s1148_s3] sm:$0x3]  ;;  %s589_s12 = scalar_lea.sflag [#allocation6], %s1060_s29  ;;  %s827_s13 = scalar_lea.vmem %s1098_s16, 16 }
  0x3f   : > { %v724_v22 = vpack.c.bf16 %v407_v21, %v406_v20  ;;  %v363_v30 = vadd.s32 4294967280, %v351_v25  ;;  %v354_v33 = vsub.s32 %v351_v25, %v353_v28  ;;  %v370_v35 = vadd.s32 4294967272, %v351_v25  ;;  %v687_v62 = vld [vmem:[%s1147_s2] ss:$0 sm:$0xff]  ;;  %p828_p8 = scmp.ne.s32.totalorder %s1098_s16, %s827_s13  ;;  %p1158_p9 = scmp.ne.s32.totalorder %s1154_s6, 0 }
  0x40   : > { %722 = vmatpush3.bf16.msra.mxu0 %v721_v18  ;;  %v359_v32 = vsub.s32 %v356_v27, %v353_v28  ;;  %vm416_vm5 = vcmask 261120   ;;  %vm502_vm6 = vcmask 1041408   ;;  %vm498_vm7 = vcmask 15360   ;;  %v689_v3 = vld [vmem:[%s1149_s4] ss:$0 sm:$0xff]  ;;  %s917_s21 = smov [#allocation7]  }
  0x41   : > { %328 = vadd.xlane.f32.xlu1 %v270_v10  ;;  %723 = vmatprep.subr.bf16.mxu0 %v914_v19  ;;  %v366_v38 = vsub.s32 %v363_v30, %v353_v28  ;;  %v373_v43 = vsub.s32 %v370_v35, %v353_v28  ;;  %vm586_vm8 = vcmask 253952   ;;  %p829_p11 = pnand %p828_p8, %p1158_p9  ;;  %s831_s15 = sshll.u32 %s917_s21, 4  ;;  %s832_s15 = int_to_ptr.vmem [resolvable:$false] %s831_s15 }
  0x42   : > { %324 = vadd.xlane.f32.xlu0 %v268_v11  ;;  %716 = vmatpush3.msk.msra.mxu1 %vm502_vm6, %v408_v61  ;;  %s833_s25 = scalar_lea.vmem %s832_s15, 32  ;;  %p834_p6 = scmp.lt.s32.totalorder %s1098_s16, %s832_s15 }
  0x43   : > { %p830_p0 = pneg %p829_p11  ;;  %p835_p13 = scmp.lt.s32.totalorder %s833_s25, %s827_s13 }
  0x44   : > { %725 = vmatpush3.bf16.msra.mxu0 %v724_v22 }
  0x45   : > { %340 = vmax.xlane.f32.xlu1 %v272_v12  ;;  %p836_p2 = por %p835_p13, %p834_p6 }
  0x46   : > { %338 = vmax.xlane.f32.xlu0 %v271_v13 }
  0x47   : > { %p837_p5 = pnand %p836_p2, %p830_p0 }
  0x49   : > { %344 = vmax.xlane.f32.xlu1 %v274_v14 }
  0x4a   : > { %342 = vmax.xlane.f32.xlu0 %v273_v15 }
  0xca   : > { %v327_v26 = vpop.xlane.xlu1 %326 }
  0xcb   : > { %v323_v29 = vpop.xlane.xlu0 %322  ;;  %v332_v39 = vmul.f32 0.00390625, %v327_v26 }
  0xcc   : > { %v330_v34 = vmul.f32 0.00390625, %v323_v29 }
  0xcd   : > { %v367_v49 = vrot.slane %v332_v39, %v366_v38 }
  0xce   : > { %v329_v31 = vpop.xlane.xlu1 %328  ;;  %v355_v42 = vrot.slane %v330_v34, %v354_v33 }
  0xcf   : > { %v325_v36 = vpop.xlane.xlu0 %324  ;;  %v333_v44 = vmul.f32 0.00390625, %v329_v31 }
  0xd0   : > { %v331_v37 = vmul.f32 0.00390625, %v325_v36 }
  0xd1   : > { %v374_v51 = vrot.slane %v333_v44, %v373_v43 }
  0xd2   : > { %v360_v40 = vrot.slane %v331_v37, %v359_v32  ;;  %v341_v41 = vpop.xlane.xlu1 %340 }
  0xd3   : > { %v339_v45 = vpop.xlane.xlu0 %338  ;;  %v389_v47 = vrot.slane %v341_v41, %v359_v32 }
  0xd4   : > { %v362_v46 = vsel %vm361_vm1, %v360_v40, %v355_v42  ;;  %v385_v48 = vrot.slane %v339_v45, %v354_v33 }
  0xd5   : > { %v369_v55 = vsel %vm368_vm2, %v367_v49, %v362_v46 }
  0xd6   : > { %v345_v50 = vpop.xlane.xlu1 %344  ;;  %v390_v56 = vsel %vm361_vm1, %v389_v47, %v385_v48  ;;  %v376_v59 = vsel %vm375_vm3, %v374_v51, %v369_v55 }
  0xd7   : > { %v343_v52 = vpop.xlane.xlu0 %342  ;;  %v399_v53 = vrot.slane %v345_v50, %v373_v43 }
  0xd8   : > { %v394_v54 = vrot.slane %v343_v52, %v366_v38 }
  0xda   : > { %v395_v57 = vsel %vm368_vm2, %v394_v54, %v390_v56 }
  0xdb   : > { %v400_v58 = vsel %vm375_vm3, %v399_v53, %v395_v57 }
  0xdc   : > { %v403_v60 = vsel %vm402_vm4, %v376_v59, %v400_v58 }
  0xdd   : > { %713 = vmatmul.mubr.msk.f32.vlgmr.msra.gmra.mrb[0].mxu0 %vm416_vm5, %v403_v60 }
 0x1b0   : > { %v486_v63 = vpop.f32.mrb[0].mxu0 }
 0x1b1   : > { %v487_v0 = vadd.f32 %v687_v62, %v486_v63  ;;  %v714_v1 = vpop.f32.mrb[1].mxu0 }
 0x1b3   : > { %v490_v2 = vmax.f32 %v487_v0, 0.0 }
 0x1b5   : > { %718 = vmatmul.mubr.msk.f32.vlgmr.msra.gmra.mrb[0].mxu1 %vm498_vm7, %v490_v2 }
 0x288   : > { %v572_v4 = vpop.f32.mrb[0].mxu1 }
 0x289   : > { %v573_v5 = vadd.f32 %v689_v3, %v572_v4  ;;  %v719_v6 = vpop.f32.mrb[1].mxu1 }
 0x28b   : > { %v577_v7 = vrot.slane %v573_v5, 1 }
 0x28d   : > { %v579_v8 = vadd.f32 %v577_v7, %v573_v5 }
 0x28f   : > { %v692_v9 = vmul.f32 -1.442695, %v579_v8 }
 0x291   : > { %793 = vpow2.f32 %v692_v9 }
 0x29b   : > { %v794_v10 = vpop.eup %793 }
 0x29c   : > { %v583_v11 = vadd.f32 1.0, %v794_v10 }
 0x29e   : > { %795 = vrcp.f32 %v583_v11 }
 0x2a8   : > { %v796_v12 = vpop.eup %795 }
 0x2a9   : > { %587 = vst.msk [vmem:[%s257_s14] sm:$0x1] %vm586_vm8, %v796_v12 }
 0x2aa   : > { %840 = shalt.err (!%p837_p5)
}
 0x2ab   : > { %s841_s29 = scalar_lea.hbm %s1096_s9, 16  ;;  %s845_s10 = scalar_lea.hbm %s1150_s5, 32 }
 0x2ac   : > { %p842_p4 = scmp.ne.s32.totalorder %s1096_s9, %s841_s29  ;;  %p846_p12 = scmp.lt.u32.totalorder %s1096_s9, %s1150_s5 }
 0x2ad   : > { %p847_p1 = scmp.lt.u32.totalorder %s845_s10, %s841_s29  ;;  %p849_p8 = scmp.lt.u32.totalorder %s841_s29, %s1096_s9 }
 0x2ae   : > { %p843_p7 = pnand %p842_p4, %p1158_p9 }
 0x2af   : > { %p848_p3 = por %p847_p1, %p846_p12 }
 0x2b0   : > { %p844_p10 = pneg %p843_p7 }
 0x2b1   : > { %p850_p11 = por %p849_p8, %p848_p3 }
 0x2b3   : > { %p851_p0 = pnand %p850_p11, %p844_p10 }
 0x2b5   : > { %854 = shalt.err (!%p851_p0)
}
 0x2b6   : > { %728 = dma.vmem_to_hbm [thread:$0]  (%p1158_p9), %s1098_s16, 16, %s1096_s9, %s589_s12  }
 0x2b7 PF: > { %s613_s14 = sand.u32 1, %s889_s18   ;;  %p1159_p6 = scmp.ne.s32.totalorder %s1155_s8, 0 }
 0x2b8   : > { %p1160_p13 = scmp.ge.s32.totalorder %s909_s23, 2  ;;  %s614_s17 = scalar_lea.sflag [#allocation6], %s613_s14 }
 0x2ba   : > { %p735_p2 = pnand %p1160_p13, %p1159_p6 }
 0x2bc   : > { %884 = dma.done.wait (!%p735_p2), %s614_s17, 16  }
 0x2bd   : > { %886 = vsyncadd (!%p735_p2), %s614_s17, 4294967280  ;;  %s21_s23 = sadd.s32 1, %s909_s23   ;;  %s1161_s18 = smov %s893_s19 }
 0x2be   : > { %p18_p5 = scmp.ge.s32.totalorder %s21_s23, 4   ;;  %s1162_s19 = smov %s897_s20 }
 0x2bf   : > { %s1163_s20 = smov %s1004_s7  ;;  %s1164_s21 = smov %s905_s22 }
 0x2c0   : > { %s1165_s22 = smov %s1167_s26  ;;  %20 = sbr.rel (!%p18_p5) target bundleno = 6 (0x6), region = 97 }
 0x2c7   :  { %618 = vsyncpa [#allocation5], 1 }
 0x2c8   :  { %620 = vsyncpa [#allocation5 + $0x1], 1 }
 0x2c9   :  { %621 = vsyncpa [#allocation6], 1 }
 0x2ca   :  { %623 = vsyncpa [#allocation6 + $0x1], 1 }

</bundles_post_ra>
